<compile_context>
chip_gen: v7x
topology: tpu7x:2x2x1
jax: 0.10.0
libtpu: 0.0.40
codegen_flags: <defaults>
</compile_context>

<pallas_src>
import functools
import math

import jax
import jax.numpy as jnp
from jax.experimental import pallas as pl
from jax.experimental.pallas import tpu as pltpu

ASPP_DILATIONS = (12, 24, 36)
BN_EPS = 1e-5
ACT_DTYPE = jnp.bfloat16          # activation / weight storage & MXU operand dtype


# --------------------------------------------------------------------------- #
# hardware-aware configuration
# --------------------------------------------------------------------------- #
def _vmem_capacity_bytes():
    try:
        info = pltpu.get_tpu_info()
        cap = getattr(info, "vmem_capacity_bytes", None)
        if cap:
            return int(cap)
    except Exception:
        pass
    return 64 * 1024 * 1024       # conservative default (v7x-like)


_VMEM_CAP = _vmem_capacity_bytes()
_BIG_VMEM = _VMEM_CAP >= 100 * 1024 * 1024     # v5e / v6e (128 MiB physical)
VMEM_LIMIT = (96 if _BIG_VMEM else 48) * 1024 * 1024
MM_TM_CAP = 512 if _BIG_VMEM else 256          # matmul tile ceilings
MM_TN_CAP = 1024 if _BIG_VMEM else 512
MM_TK_CAP = 1024
DC_TK_CAP = 512 if _BIG_VMEM else 256          # direct-conv Cin tile ceiling
DC_TN_CAP = 512
EW_TM_CAP = 512                                # elementwise (BN apply / dropout)
EW_TC_CAP = 512
STATS_TC = 128                                 # >=2 parallel channel programs on v7x


# --------------------------------------------------------------------------- #
# tiling helpers
# --------------------------------------------------------------------------- #
def _round_up(x, m):
    return (x + m - 1) // m * m


def _cp(c):
    """Channel count padded to a multiple of 128 (lane width)."""
    return _round_up(max(int(c), 1), 128)


def _pick_tile_m(m, cap):
    """Pick a row tile.  Prefer a divisor of m (no M-pad copy), multiples of 16 first."""
    cap = max(int(cap), 16)
    m = int(m)
    for align in (16, 8):
        t = min(cap, m)
        t -= t % align
        while t >= align:
            if m % t == 0:
                return t, m
            t -= align
    tm = min(cap, _round_up(max(m, 1), 16))
    return tm, _round_up(m, tm)


def _pick_tile_c(c, cap):
    """Largest multiple-of-128 divisor of c (c must be a multiple of 128) <= cap."""
    t = min(int(cap), int(c))
    t -= t % 128
    while t > 128 and c % t != 0:
        t -= 128
    return max(t, 128)


# --------------------------------------------------------------------------- #
# Pallas kernels
# --------------------------------------------------------------------------- #
def _matmul_kernel(a_ref, b_ref, o_ref, acc_ref):
    k = pl.program_id(2)

    @pl.when(k == 0)
    def _():
        acc_ref[...] = jnp.zeros_like(acc_ref)

    acc_ref[...] += jnp.dot(a_ref[...], b_ref[...],
                            preferred_element_type=jnp.float32)

    @pl.when(k == pl.num_programs(2) - 1)
    def _():
        o_ref[...] = acc_ref[...].astype(o_ref.dtype)


def _matmul_bias_kernel(a_ref, b_ref, bias_ref, o_ref, acc_ref):
    k = pl.program_id(2)

    @pl.when(k == 0)
    def _():
        acc_ref[...] = jnp.zeros_like(acc_ref)

    acc_ref[...] += jnp.dot(a_ref[...], b_ref[...],
                            preferred_element_type=jnp.float32)

    @pl.when(k == pl.num_programs(2) - 1)
    def _():
        o_ref[...] = (acc_ref[...] + bias_ref[...]).astype(o_ref.dtype)


def _direct_conv_kernel(x_ref, w_ref, o_ref, acc_ref, *, kh, kw, dil, ho, wo):
    """Stride-1 conv: full padded spatial slab resident in VMEM, kh*kw taps in-kernel."""
    k = pl.program_id(2)

    @pl.when(k == 0)
    def _():
        acc_ref[...] = jnp.zeros_like(acc_ref)

    for ih in range(kh):
        for iw in range(kw):
            xs = x_ref[0, ih * dil: ih * dil + ho, iw * dil: iw * dil + wo, :]
            a = xs.reshape(ho * wo, xs.shape[-1])
            acc_ref[...] += jnp.dot(a, w_ref[ih, iw],
                                    preferred_element_type=jnp.float32)

    @pl.when(k == pl.num_programs(2) - 1)
    def _():
        o_ref[0] = acc_ref[...].astype(o_ref.dtype)


def _bn_stats_kernel(x_ref, o_ref, acc_ref):
    # Rows 0 / 1 of the (8, TC) accumulator hold per-channel sum(x) / sum(x*x) in f32.
    i = pl.program_id(1)

    @pl.when(i == 0)
    def _():
        acc_ref[...] = jnp.zeros_like(acc_ref)

    x = x_ref[...].astype(jnp.float32)
    acc_ref[0:1, :] += jnp.sum(x, axis=0, keepdims=True)
    acc_ref[1:2, :] += jnp.sum(x * x, axis=0, keepdims=True)

    @pl.when(i == pl.num_programs(1) - 1)
    def _():
        o_ref[...] = acc_ref[...]


def _bn_apply_kernel(x_ref, sc_ref, sh_ref, o_ref, *, relu):
    y = x_ref[...].astype(jnp.float32) * sc_ref[...] + sh_ref[...]
    if relu:
        y = jnp.maximum(y, 0.0)
    o_ref[...] = y.astype(o_ref.dtype)


def _bn_apply_res_kernel(x_ref, r_ref, sc_ref, sh_ref, o_ref, *, relu):
    y = (x_ref[...].astype(jnp.float32) * sc_ref[...] + sh_ref[...]
         + r_ref[...].astype(jnp.float32))
    if relu:
        y = jnp.maximum(y, 0.0)
    o_ref[...] = y.astype(o_ref.dtype)


def _dropout_kernel(x_ref, o_ref, *, rate, seed):
    # Portable counter-based hash PRNG (murmur-style finalizer); lowers on TPU and in
    # interpret mode.  TODO(synk): not torch's dropout RNG stream, only distributionally equal.
    i = jax.lax.convert_element_type(pl.program_id(0), jnp.uint32)
    j = jax.lax.convert_element_type(pl.program_id(1), jnp.uint32)
    shape = x_ref.shape
    r = jax.lax.broadcasted_iota(jnp.uint32, shape, 0) + i * jnp.uint32(shape[0])
    c = jax.lax.broadcasted_iota(jnp.uint32, shape, 1) + j * jnp.uint32(shape[1])
    h = r * jnp.uint32(0x9E3779B1) + c * jnp.uint32(0x85EBCA77)
    h = h + jnp.uint32(seed & 0xFFFFFFFF) * jnp.uint32(0xC2B2AE3D)
    h = h ^ (h >> 16)
    h = h * jnp.uint32(0x7FEB352D)
    h = h ^ (h >> 15)
    h = h * jnp.uint32(0x846CA68B)
    h = h ^ (h >> 16)
    thresh = jnp.uint32(min(int(round(rate * 2 ** 32)), 2 ** 32 - 1))
    keep = (h >= thresh).astype(jnp.float32)
    scale = 1.0 / (1.0 - rate)
    o_ref[...] = (x_ref[...].astype(jnp.float32) * keep * scale).astype(o_ref.dtype)


# --------------------------------------------------------------------------- #
# Pallas wrappers
# --------------------------------------------------------------------------- #
def _pallas_matmul(a, b, bias=None, out_dtype=ACT_DTYPE):
    """(a @ b [+ bias]): bf16 MXU operands, f32 accumulation, bf16 output."""
    M, K = a.shape
    K2, N = b.shape
    assert K == K2
    TM, Mp = _pick_tile_m(M, MM_TM_CAP)
    Kp = _round_up(K, 128)
    TK = _pick_tile_c(Kp, MM_TK_CAP)
    Np = _round_up(N, 128)
    TN = _pick_tile_c(Np, MM_TN_CAP)

    a = a.astype(ACT_DTYPE)
    b = b.astype(ACT_DTYPE)
    if Mp != M or Kp != K:
        a = jnp.pad(a, ((0, Mp - M), (0, Kp - K)))
    if Kp != K or Np != N:
        b = jnp.pad(b, ((0, Kp - K), (0, Np - N)))

    if bias is None:
        kern = _matmul_kernel
        args = (a, b)
        in_specs = [
            pl.BlockSpec((TM, TK), lambda i, j, k: (i, k)),
            pl.BlockSpec((TK, TN), lambda i, j, k: (k, j)),
        ]
    else:
        bias_p = bias.astype(jnp.float32).reshape(1, N)
        if Np != N:
            bias_p = jnp.pad(bias_p, ((0, 0), (0, Np - N)))
        kern = _matmul_bias_kernel
        args = (a, b, bias_p)
        in_specs = [
            pl.BlockSpec((TM, TK), lambda i, j, k: (i, k)),
            pl.BlockSpec((TK, TN), lambda i, j, k: (k, j)),
            pl.BlockSpec((1, TN), lambda i, j, k: (0, j)),
        ]

    out = pl.pallas_call(
        kern,
        out_shape=jax.ShapeDtypeStruct((Mp, Np), out_dtype),
        grid_spec=pltpu.PrefetchScalarGridSpec(
            num_scalar_prefetch=0,
            grid=(Mp // TM, Np // TN, Kp // TK),
            in_specs=in_specs,
            out_specs=pl.BlockSpec((TM, TN), lambda i, j, k: (i, j)),
            scratch_shapes=[pltpu.VMEM((TM, TN), jnp.float32)],
        ),
        compiler_params=pltpu.CompilerParams(
            dimension_semantics=("parallel", "parallel", "arbitrary"),
            vmem_limit_bytes=VMEM_LIMIT),
    )(*args)
    if Mp != M or Np != N:
        out = out[:M, :N]
    return out


# ---- direct (no-im2col) stride-1 conv ------------------------------------- #
def _direct_conv_tiles(hp, wp, cin_p, cout_p):
    tk = _pick_tile_c(cin_p, DC_TK_CAP)
    while tk > 128 and 2 * hp * wp * tk * 2 > VMEM_LIMIT // 3:
        tk = _pick_tile_c(cin_p, tk - 128)
    tn = _pick_tile_c(cout_p, DC_TN_CAP)
    return tk, tn


@functools.lru_cache(maxsize=None)
def _direct_conv_call(n, h, w, cin_p, kh, kw, cout_p, dilation, padding):
    hp, wp = h + 2 * padding, w + 2 * padding
    ho = hp - dilation * (kh - 1)
    wo = wp - dilation * (kw - 1)
    TK, TN = _direct_conv_tiles(hp, wp, cin_p, cout_p)

    kern = functools.partial(_direct_conv_kernel, kh=kh, kw=kw, dil=dilation,
                             ho=ho, wo=wo)

    def fn(x, wgt):
        xp = jnp.pad(x.astype(ACT_DTYPE),
                     ((0, 0), (padding, padding), (padding, padding), (0, 0)))
        out = pl.pallas_call(
            kern,
            out_shape=jax.ShapeDtypeStruct((n, ho * wo, cout_p), ACT_DTYPE),
            grid_spec=pltpu.PrefetchScalarGridSpec(
                num_scalar_prefetch=0,
                grid=(n, cout_p // TN, cin_p // TK),
                in_specs=[
                    pl.BlockSpec((1, hp, wp, TK), lambda b, j, k: (b, 0, 0, k)),
                    pl.BlockSpec((kh, kw, TK, TN), lambda b, j, k: (0, 0, k, j)),
                ],
                out_specs=pl.BlockSpec((1, ho * wo, TN), lambda b, j, k: (b, 0, j)),
                scratch_shapes=[pltpu.VMEM((ho * wo, TN), jnp.float32)],
            ),
            compiler_params=pltpu.CompilerParams(
                dimension_semantics=("parallel", "parallel", "arbitrary"),
                vmem_limit_bytes=VMEM_LIMIT),
        )(xp, wgt)
        return out.reshape(n, ho, wo, cout_p)

    return jax.jit(fn)


_DIRECT_CONV_STATUS = [None]


def _direct_conv_supported():
    """One-time probe: if the direct-conv kernel fails to lower on this TPU, fall back."""
    if _DIRECT_CONV_STATUS[0] is None:
        try:
            xp = jnp.zeros((1, 8, 8, 128), ACT_DTYPE)
            wp = jnp.zeros((3, 3, 128, 128), ACT_DTYPE)
            y = _direct_conv_call(1, 8, 8, 128, 3, 3, 128, 2, 2)(xp, wp)
            jax.block_until_ready(y)
            _DIRECT_CONV_STATUS[0] = True
        except Exception:
            _DIRECT_CONV_STATUS[0] = False
    return _DIRECT_CONV_STATUS[0]


def _direct_conv_ok(n, h, w, cin_p, kh, kw, cout_p, dilation, padding):
    if cin_p % 128 or cout_p % 128:
        return False
    hp, wp = h + 2 * padding, w + 2 * padding
    ho = hp - dilation * (kh - 1)
    wo = wp - dilation * (kw - 1)
    if ho <= 0 or wo <= 0 or wo % 8:
        return False
    tk, tn = _direct_conv_tiles(hp, wp, cin_p, cout_p)
    budget = (2 * hp * wp * tk * 2 + 2 * kh * kw * tk * tn * 2
              + ho * wo * tn * 4 + 2 * ho * wo * tn * 2)
    if budget > int(VMEM_LIMIT * 0.8):
        return False
    return _direct_conv_supported()


# ---- 1x1 conv (pure matmul) & im2col fallback ------------------------------ #
@functools.lru_cache(maxsize=None)
def _conv1x1_fn(n, h, w, c, cout_p):
    def fn(x, wgt):
        a = x.reshape(n * h * w, c)
        b = wgt.reshape(c, cout_p)
        return _pallas_matmul(a, b).reshape(n, h, w, cout_p)

    return jax.jit(fn)


@functools.lru_cache(maxsize=None)
def _im2col_conv_fn(n, h, wd, c, kh, kw, cout_p, stride, dilation, padding, has_bias):
    def fn(x, wgt, *rest):
        bias = rest[0] if has_bias else None
        xl = x.astype(ACT_DTYPE)
        xp = jnp.pad(xl, ((0, 0), (padding, padding), (padding, padding), (0, 0)))
        hp, wp = h + 2 * padding, wd + 2 * padding
        ho = (hp - dilation * (kh - 1) - 1) // stride + 1
        wo = (wp - dilation * (kw - 1) - 1) // stride + 1
        # TODO(synk): im2col fallback (strided / tiny convs only) still materializes
        # kh*kw shifted copies; the large stride-1 convs use the direct Pallas kernel.
        patches = []
        for ih in range(kh):
            for iw in range(kw):
                sl = xp[:, ih * dilation: ih * dilation + (ho - 1) * stride + 1: stride,
                        iw * dilation: iw * dilation + (wo - 1) * stride + 1: stride, :]
                patches.append(sl)
        col = patches[0] if len(patches) == 1 else jnp.concatenate(patches, axis=-1)
        a = col.reshape(n * ho * wo, kh * kw * c)
        b = wgt.reshape(kh * kw * c, cout_p)
        out = _pallas_matmul(a, b, bias=bias)
        return out.reshape(n, ho, wo, cout_p)

    return jax.jit(fn)


def conv2d(x, w, bias=None, stride=1, dilation=1, padding=0):
    """x: NHWC bf16/f32 (channels already padded to 128-multiples, except the stem input);
    w: (KH, KW, Cin_pad, Cout_pad) bf16.  Returns bf16 NHWC with Cout_pad channels."""
    n, h, wd, c = x.shape
    kh, kw, cin_w, cout_p = w.shape
    assert cin_w == c
    if kh == 1 and kw == 1 and stride == 1 and padding == 0:
        return _conv1x1_fn(n, h, wd, c, cout_p)(x, w)
    if (stride == 1 and bias is None
            and _direct_conv_ok(n, h, wd, c, kh, kw, cout_p, dilation, padding)):
        return _direct_conv_call(n, h, wd, c, kh, kw, cout_p, dilation, padding)(x, w)
    fn = _im2col_conv_fn(n, h, wd, c, kh, kw, cout_p, stride, dilation, padding,
                         bias is not None)
    args = (x, w) if bias is None else (x, w, bias)
    return fn(*args)


# ---- BatchNorm (train-mode batch statistics) ------------------------------- #
@functools.lru_cache(maxsize=None)
def _bn_fn(n, h, w, cp, relu, has_res, eps):
    M = n * h * w
    TM, Mp = _pick_tile_m(M, EW_TM_CAP)
    TCa = _pick_tile_c(cp, EW_TC_CAP)
    TCs = _pick_tile_c(cp, STATS_TC)

    def fn(x, gamma_p, beta_p, *rest):
        x2 = x.reshape(M, cp)
        if Mp != M:
            x2 = jnp.pad(x2, ((0, Mp - M), (0, 0)))   # zero rows: harmless for the sums

        # pass 1: per-channel sum / sum-of-squares (f32 accumulation, M tiles last)
        stats = pl.pallas_call(
            _bn_stats_kernel,
            out_shape=jax.ShapeDtypeStruct((8, cp), jnp.float32),
            grid_spec=pltpu.PrefetchScalarGridSpec(
                num_scalar_prefetch=0,
                grid=(cp // TCs, Mp // TM),
                in_specs=[pl.BlockSpec((TM, TCs), lambda j, i: (i, j))],
                out_specs=pl.BlockSpec((8, TCs), lambda j, i: (0, j)),
                scratch_shapes=[pltpu.VMEM((8, TCs), jnp.float32)],
            ),
            compiler_params=pltpu.CompilerParams(
                dimension_semantics=("parallel", "arbitrary"),
                vmem_limit_bytes=VMEM_LIMIT),
        )(x2)

        # tiny per-channel glue: batch stats + gamma/beta -> scale & shift
        mean = stats[0] * (1.0 / M)
        var = jnp.maximum(stats[1] * (1.0 / M) - mean * mean, 0.0)   # clamp >= 0
        inv = jax.lax.rsqrt(var + eps)
        scale = gamma_p * inv            # padded channels: gamma = 0 -> stay exactly 0
        shift = beta_p - mean * scale
        scale2 = scale.reshape(1, cp)
        shift2 = shift.reshape(1, cp)

        # pass 2: fused affine (+residual) (+ReLU) -> bf16 activations
        if has_res:
            r2 = rest[0].reshape(M, cp)
            if Mp != M:
                r2 = jnp.pad(r2, ((0, Mp - M), (0, 0)))
            kern = functools.partial(_bn_apply_res_kernel, relu=relu)
            args = (x2, r2, scale2, shift2)
            in_specs = [
                pl.BlockSpec((TM, TCa), lambda i, j: (i, j)),
                pl.BlockSpec((TM, TCa), lambda i, j: (i, j)),
                pl.BlockSpec((1, TCa), lambda i, j: (0, j)),
                pl.BlockSpec((1, TCa), lambda i, j: (0, j)),
            ]
        else:
            kern = functools.partial(_bn_apply_kernel, relu=relu)
            args = (x2, scale2, shift2)
            in_specs = [
                pl.BlockSpec((TM, TCa), lambda i, j: (i, j)),
                pl.BlockSpec((1, TCa), lambda i, j: (0, j)),
                pl.BlockSpec((1, TCa), lambda i, j: (0, j)),
            ]

        out = pl.pallas_call(
            kern,
            out_shape=jax.ShapeDtypeStruct((Mp, cp), ACT_DTYPE),
            grid_spec=pltpu.PrefetchScalarGridSpec(
                num_scalar_prefetch=0,
                grid=(Mp // TM, cp // TCa),
                in_specs=in_specs,
                out_specs=pl.BlockSpec((TM, TCa), lambda i, j: (i, j)),
            ),
            compiler_params=pltpu.CompilerParams(
                dimension_semantics=("parallel", "parallel"),
                vmem_limit_bytes=VMEM_LIMIT),
        )(*args)
        if Mp != M:
            out = out[:M]
        return out.reshape(n, h, w, cp)

    return jax.jit(fn)


def pallas_batchnorm(x, gamma_p, beta_p, relu=True, residual=None, eps=BN_EPS):
    """Train-mode BatchNorm2d (+residual) (+ReLU); bf16 NHWC in/out, padded channels."""
    n, h, w, cp = x.shape
    fn = _bn_fn(n, h, w, cp, bool(relu), residual is not None, float(eps))
    args = (x, gamma_p, beta_p) if residual is None else (x, gamma_p, beta_p, residual)
    return fn(*args)


# ---- Dropout ---------------------------------------------------------------- #
@functools.lru_cache(maxsize=None)
def _dropout_fn(n, h, w, cp, rate, seed):
    M = n * h * w
    TM, Mp = _pick_tile_m(M, EW_TM_CAP)
    TC = _pick_tile_c(cp, EW_TC_CAP)

    def fn(x):
        x2 = x.reshape(M, cp)
        if Mp != M:
            x2 = jnp.pad(x2, ((0, Mp - M), (0, 0)))
        out = pl.pallas_call(
            functools.partial(_dropout_kernel, rate=rate, seed=seed),
            out_shape=jax.ShapeDtypeStruct((Mp, cp), x.dtype),
            grid_spec=pltpu.PrefetchScalarGridSpec(
                num_scalar_prefetch=0,
                grid=(Mp // TM, cp // TC),
                in_specs=[pl.BlockSpec((TM, TC), lambda i, j: (i, j))],
                out_specs=pl.BlockSpec((TM, TC), lambda i, j: (i, j)),
            ),
            compiler_params=pltpu.CompilerParams(
                dimension_semantics=("parallel", "parallel"),
                vmem_limit_bytes=VMEM_LIMIT),
        )(x2)
        if Mp != M:
            out = out[:M]
        return out.reshape(n, h, w, cp)

    return jax.jit(fn)


def pallas_dropout(x, seed, rate=0.5):
    n, h, w, cp = x.shape
    return _dropout_fn(n, h, w, cp, float(rate), int(seed))(x)


# --------------------------------------------------------------------------- #
# Bilinear resize (PyTorch align_corners=False), plain XLA glue
# --------------------------------------------------------------------------- #
def _source_index(out_size, in_size):
    scale = in_size / out_size
    o = jnp.arange(out_size, dtype=jnp.float32)
    src = jnp.maximum((o + 0.5) * scale - 0.5, 0.0)
    i0 = jnp.minimum(jnp.floor(src).astype(jnp.int32), in_size - 1)
    i1 = jnp.minimum(i0 + 1, in_size - 1)
    w1 = src - i0.astype(jnp.float32)
    return i0, i1, w1


@functools.lru_cache(maxsize=None)
def _resize_fn(n, h, w, c, out_h, out_w):
    def fn(x):
        # TODO(synk): final bilinear upsample left to XLA (gather + lerp) — tiny FLOPs,
        # avoids routing zero-padded K<=64 matmuls and four HBM transposes through the MXU.
        xf = x.astype(jnp.float32)
        i0, i1, wh = _source_index(out_h, h)
        top = jnp.take(xf, i0, axis=1)
        bot = jnp.take(xf, i1, axis=1)
        xh = top + (bot - top) * wh[None, :, None, None]
        j0, j1, ww = _source_index(out_w, w)
        left = jnp.take(xh, j0, axis=2)
        right = jnp.take(xh, j1, axis=2)
        return left + (right - left) * ww[None, None, :, None]

    return jax.jit(fn)


def bilinear_resize(x, out_h, out_w):
    n, h, w, c = x.shape
    return _resize_fn(n, h, w, c, out_h, out_w)(x)


# --------------------------------------------------------------------------- #
# Parameter construction (deterministic, pretrained=False semantics)
# --------------------------------------------------------------------------- #
class _KeyGen:
    def __init__(self, seed):
        self._key = jax.random.PRNGKey(seed)

    def __call__(self):
        self._key, sub = jax.random.split(self._key)
        return sub


def conv_w(kg, kh, kw, cin, cout, cin_pad=None):
    # kaiming_normal_(mode='fan_out', nonlinearity='relu'); stored pre-padded in bf16.
    cin_pad = _cp(cin) if cin_pad is None else cin_pad
    cout_pad = _cp(cout)
    std = math.sqrt(2.0 / (cout * kh * kw))
    wt = jax.random.normal(kg(), (kh, kw, cin, cout), jnp.float32) * std
    wt = jnp.pad(wt, ((0, 0), (0, 0), (0, cin_pad - cin), (0, cout_pad - cout)))
    return wt.astype(ACT_DTYPE)


def _bn_params(c):
    cp_ = _cp(c)
    gamma = jnp.pad(jnp.ones((c,), jnp.float32), (0, cp_ - c))   # pad channels -> 0
    beta = jnp.zeros((cp_,), jnp.float32)
    return gamma, beta


def make_bottleneck_params(kg, inplanes, planes, downsample):
    width = planes
    p = {'w1': conv_w(kg, 1, 1, inplanes, width),
         'w2': conv_w(kg, 3, 3, width, width),
         'w3': conv_w(kg, 1, 1, width, planes * 4)}
    p['g1'], p['b1'] = _bn_params(width)
    p['g2'], p['b2'] = _bn_params(width)
    p['g3'], p['b3'] = _bn_params(planes * 4)
    if downsample:
        p['wd'] = conv_w(kg, 1, 1, inplanes, planes * 4)
        p['gd'], p['bd'] = _bn_params(planes * 4)
    return p


def make_layer(kg, inplanes, planes, blocks, stride, dilate, dilation):
    prev_dilation = dilation
    if dilate:
        dilation *= stride
        stride = 1
    layer = []
    downsample = (stride != 1) or (inplanes != planes * 4)
    layer.append((make_bottleneck_params(kg, inplanes, planes, downsample),
                  stride, prev_dilation))
    inplanes = planes * 4
    for _ in range(1, blocks):
        layer.append((make_bottleneck_params(kg, inplanes, planes, False), 1, dilation))
    return layer, inplanes, dilation


def build_params(kg, num_classes):
    P = {'stem_w': conv_w(kg, 7, 7, 3, 64, cin_pad=3)}
    P['stem_g'], P['stem_b'] = _bn_params(64)
    inplanes, dilation = 64, 1
    # ResNet-101 with replace_stride_with_dilation=[False, True, True] (output stride 8)
    for name, planes, blocks, stride, dilate in (
            ('layer1', 64, 3, 1, False), ('layer2', 128, 4, 2, False),
            ('layer3', 256, 23, 2, True), ('layer4', 512, 3, 2, True)):
        P[name], inplanes, dilation = make_layer(kg, inplanes, planes, blocks,
                                                 stride, dilate, dilation)
    aspp = {'b0_w': conv_w(kg, 1, 1, 2048, 256)}
    aspp['b0_g'], aspp['b0_b'] = _bn_params(256)
    for i, _d in enumerate(ASPP_DILATIONS):
        aspp[f'b{i + 1}_w'] = conv_w(kg, 3, 3, 2048, 256)
        aspp[f'b{i + 1}_g'], aspp[f'b{i + 1}_b'] = _bn_params(256)
    aspp['bp_w'] = conv_w(kg, 1, 1, 2048, 256)
    aspp['bp_g'], aspp['bp_b'] = _bn_params(256)
    aspp['proj_w'] = conv_w(kg, 1, 1, 5 * 256, 256)
    aspp['proj_g'], aspp['proj_b'] = _bn_params(256)
    P['aspp'] = aspp
    P['head_w'] = conv_w(kg, 3, 3, 256, 256)
    P['head_g'], P['head_b'] = _bn_params(256)
    # classifier[-1] replaced: 3x3 kaiming-normal(fan_out) weight, zero bias; padding
    # stays 0 (it replaced a 1x1 conv) -> output spatial shrinks by 2 before upsampling.
    P['cls_w'] = conv_w(kg, 3, 3, 256, num_classes)
    P['cls_b'] = jnp.zeros((_cp(num_classes),), jnp.float32)
    P['num_classes'] = num_classes
    return P


# --------------------------------------------------------------------------- #
# Forward pass
# --------------------------------------------------------------------------- #
def bottleneck_forward(x, p, stride, dilation):
    out = conv2d(x, p['w1'])
    out = pallas_batchnorm(out, p['g1'], p['b1'], relu=True)
    out = conv2d(out, p['w2'], stride=stride, dilation=dilation, padding=dilation)
    out = pallas_batchnorm(out, p['g2'], p['b2'], relu=True)
    out = conv2d(out, p['w3'])
    if 'wd' in p:
        identity = conv2d(x, p['wd'], stride=stride)
        identity = pallas_batchnorm(identity, p['gd'], p['bd'], relu=False)
    else:
        identity = x
    return pallas_batchnorm(out, p['g3'], p['b3'], relu=True, residual=identity)


def aspp_forward(x, p, seed):
    n, h, w, _cpch = x.shape
    outs = [pallas_batchnorm(conv2d(x, p['b0_w']), p['b0_g'], p['b0_b'], relu=True)]
    for i, d in enumerate(ASPP_DILATIONS):
        y = conv2d(x, p[f'b{i + 1}_w'], dilation=d, padding=d)
        outs.append(pallas_batchnorm(y, p[f'b{i + 1}_g'], p[f'b{i + 1}_b'], relu=True))
    # ASPPPooling: global avg pool -> 1x1 conv -> BN -> ReLU -> bilinear back to (h, w)
    # TODO(synk): global average pool (tiny reduction) stays in plain JAX glue.
    g = jnp.mean(x.astype(jnp.float32), axis=(1, 2), keepdims=True)
    y = pallas_batchnorm(conv2d(g, p['bp_w']), p['bp_g'], p['bp_b'], relu=True)
    outs.append(jnp.broadcast_to(y, (n, h, w, y.shape[-1])))  # bilinear from 1x1 == broadcast
    y = jnp.concatenate(outs, axis=-1)
    y = pallas_batchnorm(conv2d(y, p['proj_w']), p['proj_g'], p['proj_b'], relu=True)
    return pallas_dropout(y, seed=seed, rate=0.5)


def deeplabv3_forward(x_nchw, P, dropout_seed=0):
    n, _c, H, W = x_nchw.shape
    x = jnp.transpose(x_nchw, (0, 2, 3, 1)).astype(jnp.float32)   # NCHW -> NHWC
    # ---- ResNet-101 backbone (output stride 8) ----
    x = conv2d(x, P['stem_w'], stride=2, padding=3)
    x = pallas_batchnorm(x, P['stem_g'], P['stem_b'], relu=True)
    # TODO(synk): 3x3/s2 max-pool done with lax.reduce_window glue (tiny reduction).
    x = jax.lax.reduce_window(x, jnp.asarray(-jnp.inf, x.dtype), jax.lax.max,
                              (1, 3, 3, 1), (1, 2, 2, 1),
                              ((0, 0), (1, 1), (1, 1), (0, 0)))
    for name in ('layer1', 'layer2', 'layer3', 'layer4'):
        for p, s, d in P[name]:
            x = bottleneck_forward(x, p, s, d)
    # ---- classifier: DeepLabHead (ASPP -> 3x3 conv/BN/ReLU -> replaced 3x3 conv) ----
    x = aspp_forward(x, P['aspp'], dropout_seed)
    x = conv2d(x, P['head_w'], padding=1)
    x = pallas_batchnorm(x, P['head_g'], P['head_b'], relu=True)
    x = conv2d(x, P['cls_w'], bias=P['cls_b'], padding=0)
    # ---- final bilinear upsample to the input size (align_corners=False) ----
    x = bilinear_resize(x[..., :P['num_classes']], H, W)
    return jnp.transpose(x, (0, 3, 1, 2))                          # NHWC -> NCHW
    # NOTE: aux_classifier is never computed since forward() returns only result['out'].


# --------------------------------------------------------------------------- #
if __name__ == "__main__":
    NUM_CLASSES = 21
    kg = _KeyGen(0)                       # jax.random.PRNGKey(0) based
    params = build_params(kg, NUM_CLASSES)
    # 64x64 input: >= 32 so the replaced 3x3/pad0 classifier conv has a positive output
    # size at output-stride 8, and every stride-1 3x3 feature map is 8-aligned so the
    # direct-conv Pallas path is exercised (non-aligned shapes fall back automatically).
    x = jax.random.normal(kg(), (2, 3, 64, 64), jnp.float32)
    out = deeplabv3_forward(x, params, dropout_seed=0)
    out = jax.block_until_ready(out)
    assert out.shape == (2, NUM_CLASSES, 64, 64), out.shape
    assert bool(jnp.all(jnp.isfinite(out)))
    print("KERNEL_OK")
</pallas_src>

<mosaic_0001>
module attributes {stable_mosaic.version = 11 : i64} {
  func.func @_matmul_kernel(%arg0: i32, %arg1: i32, %arg2: i32, %arg3: memref<256x256xbf16, #tpu.memory_space<vmem>>, %arg4: memref<256x128xbf16, #tpu.memory_space<vmem>>, %arg5: memref<256x128xbf16, #tpu.memory_space<vmem>>, %arg6: memref<256x128xf32, #tpu.memory_space<vmem>>) attributes {dimension_semantics = [#tpu.dimension_semantics<parallel>, #tpu.dimension_semantics<parallel>, #tpu.dimension_semantics<arbitrary>], iteration_bounds = array<i64: 8, 1, 1>, scalar_prefetch = 0 : i64, scratch_operands = 1 : i64, tpu.core_type = #tpu.core_type<tc>, window_params = [{transform_indices = @transform_0, window_bounds = array<i64: 256, 256>}, {transform_indices = @transform_1, window_bounds = array<i64: 256, 128>}, {transform_indices = @transform_2, window_bounds = array<i64: 256, 128>}]} {
    %c0_i32 = arith.constant 0 : i32
    %0 = arith.cmpi eq, %arg2, %c0_i32 : i32
    %1 = arith.extui %0 : i1 to i32
    %c0_i32_0 = arith.constant 0 : i32
    %2 = arith.cmpi ne, %1, %c0_i32_0 : i32
    scf.if %2 {
      %cst_10 = arith.constant 0.000000e+00 : f32
      %12 = vector.broadcast %cst_10 : f32 to vector<256x128xf32>
      %c0_11 = arith.constant 0 : index
      %c0_12 = arith.constant 0 : index
      %13 = vector.load %arg6[%c0_11, %c0_12] : memref<256x128xf32, #tpu.memory_space<vmem>>, vector<256x128xf32>
      tpu.vector_store %arg6[%c0_11, %c0_12], %12 {strides = array<i32>} : memref<256x128xf32, #tpu.memory_space<vmem>>, vector<256x128xf32>,
    } else {
    }
    %c0 = arith.constant 0 : index
    %c0_1 = arith.constant 0 : index
    %3 = vector.load %arg6[%c0, %c0_1] : memref<256x128xf32, #tpu.memory_space<vmem>>, vector<256x128xf32>
    %c0_2 = arith.constant 0 : index
    %c0_3 = arith.constant 0 : index
    %4 = vector.load %arg3[%c0_2, %c0_3] : memref<256x256xbf16, #tpu.memory_space<vmem>>, vector<256x256xbf16>
    %c0_4 = arith.constant 0 : index
    %c0_5 = arith.constant 0 : index
    %5 = vector.load %arg4[%c0_4, %c0_5] : memref<256x128xbf16, #tpu.memory_space<vmem>>, vector<256x128xbf16>
    %cst = arith.constant dense<0.000000e+00> : vector<256x128xf32>
    %6 = tpu.matmul %4, %5, %cst {dimension_numbers = #tpu.dot_dimension_numbers<[1], [0], [0], [1], [0, 0, 1, 1], [], []>} : vector<256x256xbf16>, vector<256x128xbf16>, vector<256x128xf32> -> vector<256x128xf32>
    %7 = arith.addf %3, %6 : vector<256x128xf32>
    %c0_6 = arith.constant 0 : index
    %c0_7 = arith.constant 0 : index
    %8 = vector.load %arg6[%c0_6, %c0_7] : memref<256x128xf32, #tpu.memory_space<vmem>>, vector<256x128xf32>
    tpu.vector_store %arg6[%c0_6, %c0_7], %7 {strides = array<i32>} : memref<256x128xf32, #tpu.memory_space<vmem>>, vector<256x128xf32>,
    %c0_i32_8 = arith.constant 0 : i32
    %9 = arith.cmpi eq, %arg2, %c0_i32_8 : i32
    %10 = arith.extui %9 : i1 to i32
    %c0_i32_9 = arith.constant 0 : i32
    %11 = arith.cmpi ne, %10, %c0_i32_9 : i32
    scf.if %11 {
      %c0_10 = arith.constant 0 : index
      %c0_11 = arith.constant 0 : index
      %12 = vector.load %arg6[%c0_10, %c0_11] : memref<256x128xf32, #tpu.memory_space<vmem>>, vector<256x128xf32>
      %13 = arith.truncf %12 : vector<256x128xf32> to vector<256x128xbf16>
      %c0_12 = arith.constant 0 : index
      %c0_13 = arith.constant 0 : index
      %14 = vector.load %arg5[%c0_12, %c0_13] : memref<256x128xbf16, #tpu.memory_space<vmem>>, vector<256x128xbf16>
      tpu.vector_store %arg5[%c0_12, %c0_13], %13 {strides = array<i32>} : memref<256x128xbf16, #tpu.memory_space<vmem>>, vector<256x128xbf16>,
    } else {
    }
    return
  }
  func.func @transform_0(%arg0: i32, %arg1: i32, %arg2: i32) -> (i32, i32) {
    %c0_i32 = arith.constant 0 : i32
    return %arg0, %arg2 : i32, i32
  }
  func.func @transform_1(%arg0: i32, %arg1: i32, %arg2: i32) -> (i32, i32) {
    %c0_i32 = arith.constant 0 : i32
    return %arg2, %arg1 : i32, i32
  }
  func.func @transform_2(%arg0: i32, %arg1: i32, %arg2: i32) -> (i32, i32) {
    %c0_i32 = arith.constant 0 : i32
    return %arg0, %arg1 : i32, i32
  }
}

</mosaic_0001>

<bundles_post_ra>
// kernel: fn.1
= control target key start
LH: loop header
LB: loop body
LE: loop exit
PB: predicated region body
PF: predicated region fallthrough
CT: control target
= control target key end

     0   :  { %7 = vsyncpa [#allocation4], 0  ;;  %s1931_s0 = inlined_call_operand.vmem [shape: bf16[2048,256], index: 0, kind: input, shape index: {}]   ;;  %s1932_s1 = inlined_call_operand.vmem [shape: bf16[256,128], index: 1, kind: input, shape index: {}]   ;;  %s1933_s2 = inlined_call_operand.hbm [shape: bf16[2048,128], index: 2, kind: output, shape index: {}]  }
   0x1   :  { %9 = vsyncpa [#allocation4 + $0x1], 0  ;;  %s1712_s9 = smov 0   ;;  %s1714_s10 = smov 0  }
   0x2   :  { %s1716_s11 = smov 0   ;;  %s1718_s12 = smov 0  }
   0x3   :  { %s1720_s13 = smov 0   ;;  %s1722_s14 = smov 0  }
   0x4 LB: > { %s1141_s15 = sadd.s32 4294967295, %s1692_s14   ;;  %s1142_s16 = sadd.s32 4294967294, %s1692_s14   ;;  %s1692_s14 = sphi %s1722_s14, %s15_s14   ;;  %s1688_s13 = sphi %s1720_s13, %s1940_s13   ;;  %s1684_s12 = sphi %s1718_s12, %s1939_s12   ;;  %s1680_s11 = sphi %s1716_s11, %s1938_s11   ;;  %s1676_s10 = sphi %s1714_s10, %s1937_s10   ;;  %s1672_s9 = sphi %s1712_s9, %s1936_s9  }
   0x5   : > { %s34_s17 = sadd.s32 1, %s1688_s13  ;;  %s99_s18 = sadd.s32 1, %s1680_s11 }
   0x6   : > { %p36_p0 = scmp.ge.s32.totalorder %s34_s17, 8  ;;  %p109_p1 = scmp.ne.s32.totalorder %s1680_s11, %s1676_s10 }
   0x7   : > { %p110_p2 = scmp.eq.s32.totalorder %s1141_s15, 7  ;;  %p115_p3 = scmp.ne.s32.totalorder %s1676_s10, %s1672_s9 }
   0x8   : > { %s1942_s17 = smov (%p36_p0, %s34_s17), 0  ;;  %p116_p5 = scmp.eq.s32.totalorder %s1142_s16, 7 }
   0x9   : > { %p1752_p4 = por %p110_p2, %p109_p1  ;;  %s94_s20 = ssub.s32 %s1688_s13, %s1942_s17 }
   0xa   : > { %p1146_p6 = scmp.ge.s32.totalorder %s1692_s14, 1  ;;  %p97_p7 = scmp.eq.s32.totalorder %s94_s20, 0 }
   0xb   : > { %p1759_p8 = por %p116_p5, %p115_p3  ;;  %p161_p9 = scmp.lt.s32.totalorder %s1692_s14, 9 }
   0xc   : > { %s1765_s22 = scalar_select %p97_p7, %s1680_s11, %s99_s18  }
   0xd   : > { %p162_p10 = pnand %p1146_p6, %p161_p9 }
   0xe   : > { %v1550_v0 = vld [vmem:[%s1932_s1 + $0x40] sm:$0xff] (!%p162_p10)   ;;  %s1148_s25 = sshll.u32 (!%p162_p10), %s1684_s12, 5  ;;  %v1552_v2 = vld [vmem:[%s1932_s1 + $0x48] sm:$0xff] (!%p162_p10)   ;;  %v1554_v4 = vld [vmem:[%s1932_s1 + $0x50] sm:$0xff] (!%p162_p10)   ;;  %s193_s24 = sand.u32 (!%p162_p10), 1, %s1676_s10  }
   0xf   : > { %165 = sbr.rel (%p162_p10) target bundleno = 337 (0x151), region = 28  ;;  %v1551_v1 = vld [vmem:[%s1932_s1] sm:$0xff] (!%p162_p10)   ;;  %1365 = vmatprep.subr.bf16.mxu0 (!%p162_p10), %v1550_v0  ;;  %1477 = vmatprep.subr.bf16.mxu1 (!%p162_p10), %v1550_v0  ;;  %v1553_v3 = vld [vmem:[%s1932_s1 + $0x8] sm:$0xff] (!%p162_p10)   ;;  %p198_p11 = scmp.lt.s32.totalorder (!%p162_p10), %s1148_s25, 255  ;;  %v1555_v5 = vld [vmem:[%s1932_s1 + $0x10] sm:$0xff] (!%p162_p10)  }
  0x10   : > { %1366 = vmatpush3.bf16.msra.mxu0 (!%p162_p10), %v1551_v1  ;;  %1485 = vmatpush3.bf16.msra.mxu1 (!%p162_p10), %v1551_v1  ;;  %v1556_v6 = vld [vmem:[%s1932_s1 + $0x58] sm:$0xff] (!%p162_p10)   ;;  %v1558_v8 = vld [vmem:[%s1932_s1 + $0x60] sm:$0xff] (!%p162_p10)   ;;  %v1560_v10 = vld [vmem:[%s1932_s1 + $0x68] sm:$0xff] (!%p162_p10)   ;;  %s1147_s26 = sshll.u32 (!%p162_p10), %s193_s24, 7  ;;  %s1694_s5 = smov (!%p162_p10), [#allocation3]  }
  0x11   : > { %1367 = vmatprep.subr.bf16.mxu0 (!%p162_p10), %v1552_v2  ;;  %1478 = vmatprep.subr.bf16.mxu1 (!%p162_p10), %v1552_v2  ;;  %v1557_v7 = vld [vmem:[%s1932_s1 + $0x18] sm:$0xff] (!%p162_p10)   ;;  %v1559_v9 = vld [vmem:[%s1932_s1 + $0x20] sm:$0xff] (!%p162_p10)   ;;  %v1561_v13 = vld [vmem:[%s1932_s1 + $0x28] sm:$0xff] (!%p162_p10)   ;;  %s1856_s27 = scalar_lea.vmem (!%p162_p10), [#allocation3], %s1147_s26  ;;  %s1618_s6 = sshll.u32 (!%p162_p10), %s1694_s5, 4  ;;  %s1619_s6 = int_to_ptr.vmem [resolvable:$false] %s1618_s6 }
  0x12   : > { %v1562_v14 = vld [vmem:[%s1932_s1 + $0x70] sm:$0xff] (!%p162_p10)   ;;  %v1564_v16 = vld [vmem:[%s1932_s1 + $0x78] sm:$0xff] (!%p162_p10)   ;;  %s1042_s29 = sshll.u32 (!%p162_p10), %s1856_s27, 4  ;;  %s1620_s7 = scalar_lea.vmem (!%p162_p10), %s1619_s6, 4096  ;;  %s1879_s29 = int_to_ptr.vmem [resolvable:$true] %s1042_s29 }
  0x13   : > { %v1563_v15 = vld [vmem:[%s1932_s1 + $0x30] sm:$0xff] (!%p162_p10)   ;;  %v1565_v17 = vld [vmem:[%s1932_s1 + $0x38] sm:$0xff] (!%p162_p10)   ;;  %s1614_s4 = scalar_lea.vmem (!%p162_p10), %s1879_s29, 2048  ;;  %p1621_p1 = scmp.lt.s32.totalorder (!%p162_p10), %s1879_s29, %s1619_s6 }
  0x14   : > { %1368 = vmatpush3.bf16.msra.mxu0 (!%p162_p10), %v1553_v3  ;;  %1486 = vmatpush3.bf16.msra.mxu1 (!%p162_p10), %v1553_v3  ;;  %p1615_p12 = scmp.ne.s32.totalorder (!%p162_p10), %s1879_s29, %s1614_s4  ;;  %p1622_p2 = scmp.lt.s32.totalorder (!%p162_p10), %s1620_s7, %s1614_s4 }
  0x15   : > { %1369 = vmatprep.subr.bf16.mxu0 (!%p162_p10), %v1554_v4  ;;  %1479 = vmatprep.subr.bf16.mxu1 (!%p162_p10), %v1554_v4 }
  0x16   : > { %s1944_s25 = smov (!%p198_p11, %s1148_s25), 255  ;;  %p1616_p13 = pnand %p1615_p12, %p1752_p4 }
  0x17   : > { %s1236_s20 = sshll.u32 %s1944_s25, 3  ;;  %p1623_p3 = por %p1622_p2, %p1621_p1 }
  0x18   : > { %1370 = vmatpush3.bf16.msra.mxu0 %v1555_v5  ;;  %1487 = vmatpush3.bf16.msra.mxu1 %v1555_v5  ;;  %s1798_s28 = scalar_lea.vmem %s1931_s0, %s1236_s20  ;;  %p1617_p0 = pneg %p1616_p13 }
  0x19   : > { %1371 = vmatprep.subr.bf16.mxu0 %v1556_v6  ;;  %1480 = vmatprep.subr.bf16.mxu1 %v1556_v6  ;;  %v1568_v11 = vld [vmem:[%s1798_s28 + $0x4] ss:$8 sps:$4 sm:$0xff]   ;;  %v1566_v18 = vld [vmem:[%s1798_s28] ss:$8 sps:$4 sm:$0xff]   ;;  %v1572_v20 = vld [vmem:[%s1798_s28 + $0x14] ss:$8 sps:$4 sm:$0xff]  }
  0x1a   : > { %v1571_v12 = vld [vmem:[%s1798_s28 + $0x84] ss:$8 sps:$4 sm:$0xff]   ;;  %639 = vmatprep.mubr.bf16.mxu0 %v1568_v11  ;;  %v1569_v19 = vld [vmem:[%s1798_s28 + $0x80] ss:$8 sps:$4 sm:$0xff]   ;;  %v1574_v21 = vld [vmem:[%s1798_s28 + $0x94] ss:$8 sps:$4 sm:$0xff]   ;;  %p1624_p5 = pnand %p1623_p3, %p1617_p0 }
  0x1b   : > { %703 = vmatprep.mubr.bf16.mxu1 %v1571_v12  ;;  %v1576_v22 = vld [vmem:[%s1798_s28 + $0x10] ss:$8 sps:$4 sm:$0xff]   ;;  %v1578_v24 = vld [vmem:[%s1798_s28 + $0x24] ss:$8 sps:$4 sm:$0xff]   ;;  %v1582_v26 = vld [vmem:[%s1798_s28 + $0x20] ss:$8 sps:$4 sm:$0xff]  }
  0x1c   : > { %1372 = vmatpush3.bf16.msra.mxu0 %v1557_v7  ;;  %1488 = vmatpush3.bf16.msra.mxu1 %v1557_v7  ;;  %v1577_v23 = vld [vmem:[%s1798_s28 + $0x90] ss:$8 sps:$4 sm:$0xff]   ;;  %v1580_v25 = vld [vmem:[%s1798_s28 + $0xa4] ss:$8 sps:$4 sm:$0xff]   ;;  %v1583_v27 = vld [vmem:[%s1798_s28 + $0xa0] ss:$8 sps:$4 sm:$0xff]  }
  0x1d   : > { %1373 = vmatprep.subr.bf16.mxu0 %v1558_v8  ;;  %1481 = vmatprep.subr.bf16.mxu1 %v1558_v8  ;;  %v1584_v28 = vld [vmem:[%s1798_s28 + $0x34] ss:$8 sps:$4 sm:$0xff]   ;;  %v1588_v30 = vld [vmem:[%s1798_s28 + $0x30] ss:$8 sps:$4 sm:$0xff]   ;;  %v1590_v32 = vld [vmem:[%s1798_s28 + $0x44] ss:$8 sps:$4 sm:$0xff]  }
  0x1e   : > { %v1586_v29 = vld [vmem:[%s1798_s28 + $0xb4] ss:$8 sps:$4 sm:$0xff]   ;;  %v1589_v31 = vld [vmem:[%s1798_s28 + $0xb0] ss:$8 sps:$4 sm:$0xff]   ;;  %v1592_v33 = vld [vmem:[%s1798_s28 + $0xc4] ss:$8 sps:$4 sm:$0xff]  }
  0x1f   : > { %v1594_v34 = vld [vmem:[%s1798_s28 + $0x40] ss:$8 sps:$4 sm:$0xff]   ;;  %v1596_v36 = vld [vmem:[%s1798_s28 + $0x54] ss:$8 sps:$4 sm:$0xff]   ;;  %v1600_v38 = vld [vmem:[%s1798_s28 + $0x50] ss:$8 sps:$4 sm:$0xff]  }
  0x20   : > { %1374 = vmatpush3.bf16.msra.mxu0 %v1559_v9  ;;  %1489 = vmatpush3.bf16.msra.mxu1 %v1559_v9  ;;  %v1595_v35 = vld [vmem:[%s1798_s28 + $0xc0] ss:$8 sps:$4 sm:$0xff]   ;;  %v1598_v37 = vld [vmem:[%s1798_s28 + $0xd4] ss:$8 sps:$4 sm:$0xff]   ;;  %v1601_v39 = vld [vmem:[%s1798_s28 + $0xd0] ss:$8 sps:$4 sm:$0xff]  }
  0x21   : > { %1375 = vmatprep.subr.bf16.mxu0 %v1560_v10  ;;  %1482 = vmatprep.subr.bf16.mxu1 %v1560_v10  ;;  %v1602_v40 = vld [vmem:[%s1798_s28 + $0x64] ss:$8 sps:$4 sm:$0xff]   ;;  %v1606_v42 = vld [vmem:[%s1798_s28 + $0x60] ss:$8 sps:$4 sm:$0xff]   ;;  %v1608_v44 = vld [vmem:[%s1798_s28 + $0x74] ss:$8 sps:$4 sm:$0xff]  }
  0x22   : > { %v1604_v41 = vld [vmem:[%s1798_s28 + $0xe4] ss:$8 sps:$4 sm:$0xff]   ;;  %v1607_v43 = vld [vmem:[%s1798_s28 + $0xe0] ss:$8 sps:$4 sm:$0xff]   ;;  %v1610_v45 = vld [vmem:[%s1798_s28 + $0xf4] ss:$8 sps:$4 sm:$0xff]  }
  0x23   : > { %v1612_v46 = vld [vmem:[%s1798_s28 + $0x70] ss:$8 sps:$4 sm:$0xff]  }
  0x24   : > { %1376 = vmatpush3.bf16.msra.mxu0 %v1561_v13  ;;  %1490 = vmatpush3.bf16.msra.mxu1 %v1561_v13  ;;  %v1613_v47 = vld [vmem:[%s1798_s28 + $0xf0] ss:$8 sps:$4 sm:$0xff]   ;;  %s1269_s28 = sshll.u32 %s1684_s12, 11  ;;  %s1885_s12 = scalar_lea.sflag [#allocation4], %s193_s24 }
  0x25   : > { %1377 = vmatprep.subr.bf16.mxu0 %v1562_v14  ;;  %1483 = vmatprep.subr.bf16.mxu1 %v1562_v14  ;;  %s1877_s3 = scalar_lea.hbm %s1933_s2, %s1269_s28 }
  0x28   : > { %1378 = vmatpush3.bf16.msra.mxu0 %v1563_v15  ;;  %1491 = vmatpush3.bf16.msra.mxu1 %v1563_v15 }
  0x29   : > { %1379 = vmatprep.subr.bf16.mxu0 %v1564_v16  ;;  %1484 = vmatprep.subr.bf16.mxu1 %v1564_v16 }
  0x2c   : > { %1380 = vmatpush3.bf16.msra.mxu0 %v1565_v17  ;;  %1492 = vmatpush3.bf16.msra.mxu1 %v1565_v17 }
  0x2f   : > { %640 = vmatmul.mubr.bf16.vlgmr.msra.gmra.mrb[0].mxu0 %v1566_v18  ;;  %704 = vmatmul.mubr.bf16.vlgmr.msra.gmra.mrb[0].mxu1 %v1569_v19 }
  0x30   : > { %647 = vmatprep.mubr.bf16.mxu0 %v1572_v20  ;;  %711 = vmatprep.mubr.bf16.mxu1 %v1574_v21 }
  0x37   : > { %648 = vmatmul.mubr.bf16.gmra.mrb[4].mxu0 %v1576_v22  ;;  %712 = vmatmul.mubr.bf16.gmra.mrb[4].mxu1 %v1577_v23 }
  0x38   : > { %655 = vmatprep.mubr.bf16.mxu0 %v1578_v24  ;;  %719 = vmatprep.mubr.bf16.mxu1 %v1580_v25 }
  0x3f   : > { %656 = vmatmul.mubr.bf16.gmra.mrb[8].mxu0 %v1582_v26  ;;  %720 = vmatmul.mubr.bf16.gmra.mrb[8].mxu1 %v1583_v27 }
  0x40   : > { %663 = vmatprep.mubr.bf16.mxu0 %v1584_v28  ;;  %727 = vmatprep.mubr.bf16.mxu1 %v1586_v29 }
  0x47   : > { %664 = vmatmul.mubr.bf16.gmra.mrb[12].mxu0 %v1588_v30  ;;  %728 = vmatmul.mubr.bf16.gmra.mrb[12].mxu1 %v1589_v31 }
  0x48   : > { %671 = vmatprep.mubr.bf16.mxu0 %v1590_v32  ;;  %735 = vmatprep.mubr.bf16.mxu1 %v1592_v33 }
  0x4f   : > { %672 = vmatmul.mubr.bf16.gmra.mrb[16].mxu0 %v1594_v34  ;;  %736 = vmatmul.mubr.bf16.gmra.mrb[16].mxu1 %v1595_v35 }
  0x50   : > { %679 = vmatprep.mubr.bf16.mxu0 %v1596_v36  ;;  %743 = vmatprep.mubr.bf16.mxu1 %v1598_v37 }
  0x57   : > { %680 = vmatmul.mubr.bf16.gmra.mrb[20].mxu0 %v1600_v38  ;;  %744 = vmatmul.mubr.bf16.gmra.mrb[20].mxu1 %v1601_v39 }
  0x58   : > { %687 = vmatprep.mubr.bf16.mxu0 %v1602_v40  ;;  %751 = vmatprep.mubr.bf16.mxu1 %v1604_v41 }
  0x5f   : > { %688 = vmatmul.mubr.bf16.gmra.mrb[24].mxu0 %v1606_v42  ;;  %752 = vmatmul.mubr.bf16.gmra.mrb[24].mxu1 %v1607_v43 }
  0x60   : > { %695 = vmatprep.mubr.bf16.mxu0 %v1608_v44  ;;  %759 = vmatprep.mubr.bf16.mxu1 %v1610_v45 }
  0x67   : > { %696 = vmatmul.mubr.bf16.gmra.mrb[28].mxu0 %v1612_v46  ;;  %760 = vmatmul.mubr.bf16.gmra.mrb[28].mxu1 %v1613_v47 }
 0x102   : > { %v1381_v48 = vpop.f32.mrb[0].mxu0  ;;  %v1429_v49 = vpop.f32.mrb[0].mxu1 }
 0x103   : > { %v1382_v50 = vpop.f32.mrb[1].mxu0  ;;  %v1430_v51 = vpop.f32.mrb[1].mxu1 }
 0x104   : > { %v1383_v52 = vadd.f32 %v1382_v50, %v1381_v48  ;;  %v1431_v53 = vadd.f32 %v1430_v51, %v1429_v49  ;;  %v1384_v54 = vpop.f32.mrb[2].mxu0  ;;  %v1432_v55 = vpop.f32.mrb[2].mxu1 }
 0x105   : > { %v1385_v56 = vpop.f32.mrb[3].mxu0  ;;  %v1433_v57 = vpop.f32.mrb[3].mxu1 }
 0x106   : > { %v1386_v58 = vadd.f32 %v1385_v56, %v1384_v54  ;;  %v1434_v59 = vadd.f32 %v1433_v57, %v1432_v55 }
 0x108   : > { %v1273_v60 = vpack.c.bf16 %v1386_v58, %v1383_v52  ;;  %v1313_v61 = vpack.c.bf16 %v1434_v59, %v1431_v53 }
 0x10a   : > { %1274 = vst [vmem:[%s1856_s27] sm:$0xff] %v1273_v60   ;;  %1357 = vst [vmem:[%s1856_s27 + $0x40] sm:$0xff] %v1313_v61   ;;  %v1387_v62 = vpop.f32.mrb[4].mxu0  ;;  %v1435_v63 = vpop.f32.mrb[4].mxu1 }
 0x10b   : > { %v1388_v0 = vpop.f32.mrb[5].mxu0  ;;  %v1436_v1 = vpop.f32.mrb[5].mxu1 }
 0x10c   : > { %v1389_v2 = vadd.f32 %v1388_v0, %v1387_v62  ;;  %v1437_v3 = vadd.f32 %v1436_v1, %v1435_v63  ;;  %v1390_v4 = vpop.f32.mrb[6].mxu0  ;;  %v1438_v5 = vpop.f32.mrb[6].mxu1 }
 0x10d   : > { %v1391_v6 = vpop.f32.mrb[7].mxu0  ;;  %v1439_v7 = vpop.f32.mrb[7].mxu1 }
 0x10e   : > { %v1392_v8 = vadd.f32 %v1391_v6, %v1390_v4  ;;  %v1440_v9 = vadd.f32 %v1439_v7, %v1438_v5 }
 0x110   : > { %v1278_v10 = vpack.c.bf16 %v1392_v8, %v1389_v2  ;;  %v1318_v11 = vpack.c.bf16 %v1440_v9, %v1437_v3 }
 0x112   : > { %1350 = vst [vmem:[%s1856_s27 + $0x8] sm:$0xff] %v1278_v10   ;;  %1358 = vst [vmem:[%s1856_s27 + $0x48] sm:$0xff] %v1318_v11   ;;  %v1393_v12 = vpop.f32.mrb[8].mxu0  ;;  %v1441_v13 = vpop.f32.mrb[8].mxu1 }
 0x113   : > { %v1394_v14 = vpop.f32.mrb[9].mxu0  ;;  %v1442_v15 = vpop.f32.mrb[9].mxu1 }
 0x114   : > { %v1395_v16 = vadd.f32 %v1394_v14, %v1393_v12  ;;  %v1443_v17 = vadd.f32 %v1442_v15, %v1441_v13  ;;  %v1396_v18 = vpop.f32.mrb[10].mxu0  ;;  %v1444_v19 = vpop.f32.mrb[10].mxu1 }
 0x115   : > { %v1397_v20 = vpop.f32.mrb[11].mxu0  ;;  %v1445_v21 = vpop.f32.mrb[11].mxu1 }
 0x116   : > { %v1398_v22 = vadd.f32 %v1397_v20, %v1396_v18  ;;  %v1446_v23 = vadd.f32 %v1445_v21, %v1444_v19 }
 0x118   : > { %v1283_v24 = vpack.c.bf16 %v1398_v22, %v1395_v16  ;;  %v1323_v25 = vpack.c.bf16 %v1446_v23, %v1443_v17 }
 0x11a   : > { %1351 = vst [vmem:[%s1856_s27 + $0x10] sm:$0xff] %v1283_v24   ;;  %1359 = vst [vmem:[%s1856_s27 + $0x50] sm:$0xff] %v1323_v25   ;;  %v1399_v26 = vpop.f32.mrb[12].mxu0  ;;  %v1447_v27 = vpop.f32.mrb[12].mxu1 }
 0x11b   : > { %v1400_v28 = vpop.f32.mrb[13].mxu0  ;;  %v1448_v29 = vpop.f32.mrb[13].mxu1 }
 0x11c   : > { %v1401_v30 = vadd.f32 %v1400_v28, %v1399_v26  ;;  %v1449_v31 = vadd.f32 %v1448_v29, %v1447_v27  ;;  %v1402_v32 = vpop.f32.mrb[14].mxu0  ;;  %v1450_v33 = vpop.f32.mrb[14].mxu1 }
 0x11d   : > { %v1403_v34 = vpop.f32.mrb[15].mxu0  ;;  %v1451_v35 = vpop.f32.mrb[15].mxu1 }
 0x11e   : > { %v1404_v36 = vadd.f32 %v1403_v34, %v1402_v32  ;;  %v1452_v37 = vadd.f32 %v1451_v35, %v1450_v33 }
 0x120   : > { %v1288_v38 = vpack.c.bf16 %v1404_v36, %v1401_v30  ;;  %v1328_v39 = vpack.c.bf16 %v1452_v37, %v1449_v31 }
 0x122   : > { %1352 = vst [vmem:[%s1856_s27 + $0x18] sm:$0xff] %v1288_v38   ;;  %1360 = vst [vmem:[%s1856_s27 + $0x58] sm:$0xff] %v1328_v39   ;;  %v1405_v40 = vpop.f32.mrb[16].mxu0  ;;  %v1453_v41 = vpop.f32.mrb[16].mxu1 }
 0x123   : > { %v1406_v42 = vpop.f32.mrb[17].mxu0  ;;  %v1454_v43 = vpop.f32.mrb[17].mxu1 }
 0x124   : > { %v1407_v44 = vadd.f32 %v1406_v42, %v1405_v40  ;;  %v1455_v45 = vadd.f32 %v1454_v43, %v1453_v41  ;;  %v1408_v46 = vpop.f32.mrb[18].mxu0  ;;  %v1456_v47 = vpop.f32.mrb[18].mxu1 }
 0x125   : > { %v1409_v48 = vpop.f32.mrb[19].mxu0  ;;  %v1457_v49 = vpop.f32.mrb[19].mxu1 }
 0x126   : > { %v1410_v50 = vadd.f32 %v1409_v48, %v1408_v46  ;;  %v1458_v51 = vadd.f32 %v1457_v49, %v1456_v47 }
 0x128   : > { %v1293_v52 = vpack.c.bf16 %v1410_v50, %v1407_v44  ;;  %v1333_v53 = vpack.c.bf16 %v1458_v51, %v1455_v45 }
 0x12a   : > { %1353 = vst [vmem:[%s1856_s27 + $0x20] sm:$0xff] %v1293_v52   ;;  %1361 = vst [vmem:[%s1856_s27 + $0x60] sm:$0xff] %v1333_v53   ;;  %v1411_v54 = vpop.f32.mrb[20].mxu0  ;;  %v1459_v55 = vpop.f32.mrb[20].mxu1 }
 0x12b   : > { %v1412_v56 = vpop.f32.mrb[21].mxu0  ;;  %v1460_v57 = vpop.f32.mrb[21].mxu1 }
 0x12c   : > { %v1413_v58 = vadd.f32 %v1412_v56, %v1411_v54  ;;  %v1461_v59 = vadd.f32 %v1460_v57, %v1459_v55  ;;  %v1414_v60 = vpop.f32.mrb[22].mxu0  ;;  %v1462_v61 = vpop.f32.mrb[22].mxu1 }
 0x12d   : > { %v1415_v62 = vpop.f32.mrb[23].mxu0  ;;  %v1463_v63 = vpop.f32.mrb[23].mxu1 }
 0x12e   : > { %v1416_v0 = vadd.f32 %v1415_v62, %v1414_v60  ;;  %v1464_v1 = vadd.f32 %v1463_v63, %v1462_v61 }
 0x130   : > { %v1298_v2 = vpack.c.bf16 %v1416_v0, %v1413_v58  ;;  %v1338_v3 = vpack.c.bf16 %v1464_v1, %v1461_v59 }
 0x132   : > { %1354 = vst [vmem:[%s1856_s27 + $0x28] sm:$0xff] %v1298_v2   ;;  %1362 = vst [vmem:[%s1856_s27 + $0x68] sm:$0xff] %v1338_v3   ;;  %v1417_v4 = vpop.f32.mrb[24].mxu0  ;;  %v1465_v5 = vpop.f32.mrb[24].mxu1 }
 0x133   : > { %v1418_v6 = vpop.f32.mrb[25].mxu0  ;;  %v1466_v7 = vpop.f32.mrb[25].mxu1 }
 0x134   : > { %v1419_v8 = vadd.f32 %v1418_v6, %v1417_v4  ;;  %v1467_v9 = vadd.f32 %v1466_v7, %v1465_v5  ;;  %v1420_v10 = vpop.f32.mrb[26].mxu0  ;;  %v1468_v11 = vpop.f32.mrb[26].mxu1 }
 0x135   : > { %v1421_v12 = vpop.f32.mrb[27].mxu0  ;;  %v1469_v13 = vpop.f32.mrb[27].mxu1 }
 0x136   : > { %v1422_v14 = vadd.f32 %v1421_v12, %v1420_v10  ;;  %v1470_v15 = vadd.f32 %v1469_v13, %v1468_v11 }
 0x138   : > { %v1303_v16 = vpack.c.bf16 %v1422_v14, %v1419_v8  ;;  %v1343_v17 = vpack.c.bf16 %v1470_v15, %v1467_v9 }
 0x13a   : > { %1355 = vst [vmem:[%s1856_s27 + $0x30] sm:$0xff] %v1303_v16   ;;  %1363 = vst [vmem:[%s1856_s27 + $0x70] sm:$0xff] %v1343_v17   ;;  %v1423_v18 = vpop.f32.mrb[28].mxu0  ;;  %v1471_v19 = vpop.f32.mrb[28].mxu1 }
 0x13b   : > { %v1424_v20 = vpop.f32.mrb[29].mxu0  ;;  %v1472_v21 = vpop.f32.mrb[29].mxu1 }
 0x13c   : > { %v1425_v22 = vadd.f32 %v1424_v20, %v1423_v18  ;;  %v1473_v23 = vadd.f32 %v1472_v21, %v1471_v19  ;;  %v1426_v24 = vpop.f32.mrb[30].mxu0  ;;  %v1474_v25 = vpop.f32.mrb[30].mxu1 }
 0x13d   : > { %v1427_v26 = vpop.f32.mrb[31].mxu0  ;;  %v1475_v27 = vpop.f32.mrb[31].mxu1 }
 0x13e   : > { %v1428_v28 = vadd.f32 %v1427_v26, %v1426_v24  ;;  %v1476_v29 = vadd.f32 %v1475_v27, %v1474_v25 }
 0x140   : > { %v1308_v30 = vpack.c.bf16 %v1428_v28, %v1425_v22  ;;  %v1348_v31 = vpack.c.bf16 %v1476_v29, %v1473_v23 }
 0x142   : > { %1356 = vst [vmem:[%s1856_s27 + $0x38] sm:$0xff] %v1308_v30   ;;  %1364 = vst [vmem:[%s1856_s27 + $0x78] sm:$0xff] %v1348_v31  }
 0x143   : > { %1627 = shalt.err (!%p1624_p5)
}
 0x144   : > { %s1628_s8 = scalar_lea.hbm %s1877_s3, 2048  ;;  %s1632_s18 = scalar_lea.hbm %s1933_s2, 16384 }
 0x145   : > { %p1629_p6 = scmp.ne.s32.totalorder %s1877_s3, %s1628_s8  ;;  %p1633_p10 = scmp.lt.u32.totalorder %s1877_s3, %s1933_s2 }
 0x146   : > { %p1634_p11 = scmp.lt.u32.totalorder %s1632_s18, %s1628_s8  ;;  %p1636_p13 = scmp.lt.u32.totalorder %s1628_s8, %s1877_s3 }
 0x147   : > { %p1630_p7 = pnand %p1629_p6, %p1752_p4 }
 0x148   : > { %p1635_p12 = por %p1634_p11, %p1633_p10 }
 0x149   : > { %p1631_p9 = pneg %p1630_p7 }
 0x14a   : > { %p1637_p0 = por %p1636_p13, %p1635_p12 }
 0x14c   : > { %p1638_p1 = pnand %p1637_p0, %p1631_p9 }
 0x14e   : > { %1641 = shalt.err (!%p1638_p1)
}
 0x14f   : > { %s1695_s24 = smov 64   ;;  %s1696_s26 = smov 4  }
 0x150   : > { %1493 = dma.vmem_to_hbm [thread:$0]  (%p1752_p4), %s1879_s29, 2048, %s1877_s3, %s1885_s12, %s1695_s24, %s1695_s24, %s1696_s26  }
 0x151 PF: > { %p1499_p2 = scmp.ge.s32.totalorder %s1692_s14, 2  ;;  %s1057_s27 = sand.u32 1, %s1672_s9  }
 0x152   : > { %s1058_s28 = scalar_lea.sflag [#allocation4], %s1057_s27 }
 0x153   : > { %p1496_p3 = pnand %p1499_p2, %p1759_p8 }
 0x155   : > { %1667 = dma.done.wait (!%p1496_p3), %s1058_s28, 2048  }
 0x156   : > { %1669 = vsyncadd (!%p1496_p3), %s1058_s28, 4294965248  ;;  %s15_s14 = sadd.s32 1, %s1692_s14   ;;  %s1936_s9 = smov %s1676_s10 }
 0x157   : > { %p12_p5 = scmp.ge.s32.totalorder %s15_s14, 10   ;;  %s1937_s10 = smov %s1680_s11 }
 0x158   : > { %s1938_s11 = smov %s1765_s22  ;;  %s1939_s12 = smov %s1688_s13 }
 0x159   : > { %s1940_s13 = smov %s1942_s17  ;;  %14 = sbr.rel (!%p12_p5) target bundleno = 4 (0x4), region = 74 }
 0x160   :  { %1063 = vsyncpa [#allocation4], 1 }
 0x161   :  { %1065 = vsyncpa [#allocation4 + $0x1], 1 }

</bundles_post_ra>
